<compile_context>
chip_gen: v7x
topology: tpu7x:2x2x1
jax: 0.10.0
libtpu: 0.0.40
codegen_flags: <defaults>
</compile_context>

<pallas_src>
import functools

import jax
import jax.numpy as jnp
from jax.experimental import pallas as pl
from jax.experimental.pallas import tpu as pltpu


def _round_up(x, m):
    return ((x + m - 1) // m) * m


# ---------------------------------------------------------------------------
# Kernel: streamed patch-embed + GELU + mean-pool reduction (no head matmul).
# ---------------------------------------------------------------------------
def _encoder_kernel(patches_ref, w1_ref, b1_ref, out_ref, acc_ref, *,
                    n_valid, n_pad, tile_n):
    # patches: (1, TILE_N, F_pad) bf16   w1: (F_pad, D_pad) bf16   b1: (1, D_pad) f32
    # out: (1, 1, D_pad) f32             acc: (8, D_pad) f32 per-sublane partial sums
    n = pl.program_id(1)

    @pl.when(n == 0)
    def _():
        acc_ref[...] = jnp.zeros_like(acc_ref)

    x = patches_ref[0]                                                 # (TILE_N, F_pad) bf16
    h = jnp.dot(x, w1_ref[...], preferred_element_type=jnp.float32)   # MXU, f32 accumulation
    h = h + b1_ref[...]
    # NOTE: PyTorch nn.GELU defaults to exact erf; tanh approximation used here (EUP path)
    # and matched by the in-file reference.
    h = jax.nn.gelu(h, approximate=True)

    # Per-sublane partial sums: full-vreg VPU adds each tile; XLU reduce deferred to finalize.
    acc_ref[...] += jnp.sum(h.reshape(tile_n // 8, 8, h.shape[-1]), axis=0)

    @pl.when(n == pl.num_programs(1) - 1)
    def _():
        col = jnp.sum(acc_ref[...], axis=0, keepdims=True)             # (1, D_pad), XLU once
        if n_pad != n_valid:
            # Zero-padded patch rows each contributed exactly gelu(b1): remove analytically.
            col = col - (n_pad - n_valid) * jax.nn.gelu(b1_ref[...], approximate=True)
        out_ref[0] = col * (1.0 / n_valid)                             # mean pool, f32


# ---------------------------------------------------------------------------
# VMEM budgeting / tile selection (generation-aware).
# ---------------------------------------------------------------------------
def _vmem_capacity_bytes():
    try:
        return int(pltpu.get_tpu_info().vmem_capacity_bytes)
    except Exception:
        return 64 << 20  # conservative fallback (v7x per-TensorCore)


def _patch_depth(tile_n, f_pad):
    # Deeper prefetch only when the streamed tile is small (exposed DMA / step latency).
    return 3 if tile_n * f_pad * 2 <= (256 << 10) else 2


def _vmem_need_bytes(tile_n, f_pad, d_pad):
    patches = _patch_depth(tile_n, f_pad) * tile_n * f_pad * 2   # bf16 streamed tiles
    residents = 2 * (f_pad * d_pad * 2 + d_pad * 4)              # w1 + b1 (worst case 2 bufs)
    activ = 2 * tile_n * d_pad * 4                               # h + GELU temporaries (f32)
    acc = 8 * d_pad * 4
    outb = 2 * d_pad * 4
    return patches + residents + activ + acc + outb + (2 << 20)


def _pick_tile_n(n, f_pad, d_pad, budget, max_tile_n=None):
    cands = [2048, 1024, 512, 256, 128, 64, 32, 16]
    if n <= 1024:
        cands = [_round_up(n, 16)] + cands
    if max_tile_n is not None:
        cands = [c for c in cands if c <= max_tile_n] or [16]
    for cand in cands:
        if _vmem_need_bytes(cand, f_pad, d_pad) <= budget:
            return cand
    return cands[-1]


# ---------------------------------------------------------------------------
# Wrapper.
# ---------------------------------------------------------------------------
def inference_encoder_forward(x_nchw, params, patch_size, max_tile_n=None):
    """x_nchw: (B, C, H, W) float32. Returns (B, out_embed_dim) float32 embedding."""
    B, C, H, W = x_nchw.shape
    P = patch_size
    assert H % P == 0 and W % P == 0
    nH, nW = H // P, W // P
    N, F = nH * nW, C * P * P

    w1, b1, w2, b2 = params["w1"], params["b1"], params["w2"], params["b2"]
    D, E = w1.shape[1], w2.shape[1]

    # Lane-dense padding of the matmul K (patch features) and hidden dims.
    F_pad = _round_up(F, 128)
    D_pad = _round_up(D, 128)

    # Tile / VMEM budget.
    budget = int(_vmem_capacity_bytes() * 0.65)
    TILE_N = _pick_tile_n(N, F_pad, D_pad, budget, max_tile_n)
    N_pad = _round_up(N, TILE_N)
    n_tiles = N_pad // TILE_N
    depth = _patch_depth(TILE_N, F_pad)
    vmem_limit = int(min(max(_vmem_need_bytes(TILE_N, F_pad, D_pad), 16 << 20), budget))

    # Patchify in bf16 (half the wrapper HBM traffic): NCHW -> (B, N, C*P*P), channel-major
    # patches, matching Conv2d(C, D, P, stride=P) weights flattened as (C*P*P, D).
    # TODO(synk): move the patch gather into the kernel (NHWC input + (b, patch-tile) grid)
    # to drop this extra HBM round trip entirely.
    x_bf16 = x_nchw.astype(jnp.bfloat16)
    patches = x_bf16.reshape(B, C, nH, P, nW, P)
    patches = patches.transpose(0, 2, 4, 1, 3, 5).reshape(B, N, F)
    patches_p = jnp.pad(patches, ((0, 0), (0, N_pad - N), (0, F_pad - F)))

    w1_p = jnp.pad(w1, ((0, F_pad - F), (0, D_pad - D))).astype(jnp.bfloat16)
    b1_p = jnp.pad(b1, ((0, 0), (0, D_pad - D))).astype(jnp.float32)

    kernel = functools.partial(_encoder_kernel, n_valid=N, n_pad=N_pad, tile_n=TILE_N)

    def _build(use_pipeline_modes):
        if use_pipeline_modes:
            patch_spec = pl.BlockSpec((1, TILE_N, F_pad), lambda b, n: (b, n, 0),
                                      pipeline_mode=pl.Buffered(depth))
            w1_spec = pl.BlockSpec((F_pad, D_pad), lambda b, n: (0, 0),
                                   pipeline_mode=pl.Buffered(1))
            b1_spec = pl.BlockSpec((1, D_pad), lambda b, n: (0, 0),
                                   pipeline_mode=pl.Buffered(1))
        else:
            patch_spec = pl.BlockSpec((1, TILE_N, F_pad), lambda b, n: (b, n, 0))
            w1_spec = pl.BlockSpec((F_pad, D_pad), lambda b, n: (0, 0))
            b1_spec = pl.BlockSpec((1, D_pad), lambda b, n: (0, 0))
        return pl.pallas_call(
            kernel,
            out_shape=jax.ShapeDtypeStruct((B, 1, D_pad), jnp.float32),
            grid_spec=pltpu.PrefetchScalarGridSpec(
                num_scalar_prefetch=0,
                grid=(B, n_tiles),
                in_specs=[patch_spec, w1_spec, b1_spec],
                out_specs=pl.BlockSpec((1, 1, D_pad), lambda b, n: (b, 0, 0)),
                scratch_shapes=[pltpu.VMEM((8, D_pad), jnp.float32)],
            ),
            compiler_params=pltpu.CompilerParams(
                dimension_semantics=("parallel", "arbitrary"),
                vmem_limit_bytes=vmem_limit,
            ),
        )

    try:
        pooled_p = _build(True)(patches_p, w1_p, b1_p)
    except Exception:
        # pipeline_mode / pl.Buffered(1) not supported on this jax version: default buffering.
        pooled_p = _build(False)(patches_p, w1_p, b1_p)

    pooled = pooled_p.reshape(B, D_pad)[:, :D]        # (B, D) f32 mean-pooled features
    # Head matmul batched over M=B, kept in f32 (moved out of the kernel per perf review).
    return pooled @ w2 + b2


def make_params(key, C, P, hidden, embed_dim):
    F = C * P * P
    k1, k2, k3, k4 = jax.random.split(key, 4)
    scale1 = 1.0 / jnp.sqrt(F)
    scale2 = 1.0 / jnp.sqrt(hidden)
    return {
        "w1": jax.random.normal(k1, (F, hidden), jnp.float32) * scale1,
        "b1": jax.random.normal(k2, (1, hidden), jnp.float32) * 0.01,
        "w2": jax.random.normal(k3, (hidden, embed_dim), jnp.float32) * scale2,
        "b2": jax.random.normal(k4, (1, embed_dim), jnp.float32) * 0.01,
    }


def _reference_forward(x_nchw, params, patch_size):
    """Pure-JAX f32 reference (same tanh-GELU) for a sanity check."""
    B, C, H, W = x_nchw.shape
    P = patch_size
    nH, nW = H // P, W // P
    N, F = nH * nW, C * P * P
    patches = x_nchw.reshape(B, C, nH, P, nW, P)
    patches = patches.transpose(0, 2, 4, 1, 3, 5).reshape(B, N, F)
    h = jnp.einsum("bnf,fd->bnd", patches, params["w1"]) + params["b1"][None]
    h = jax.nn.gelu(h, approximate=True)
    pooled = jnp.mean(h, axis=1)
    return jnp.dot(pooled, params["w2"]) + params["b2"]


if __name__ == "__main__":
    # Small shapes consistent with the module's image-encoder forward:
    # batch=2, channels=4, spatial=16, patch=4, hidden=32, out_embed_dim=32.
    B, C, H, W = 2, 4, 16, 16
    P, HIDDEN, EMBED = 4, 32, 32

    key = jax.random.PRNGKey(0)
    kx, kp = jax.random.split(key)
    x = jax.random.normal(kx, (B, C, H, W), jnp.float32)
    params = make_params(kp, C, P, HIDDEN, EMBED)

    emb = inference_encoder_forward(x, params, patch_size=P)
    emb = jax.block_until_ready(emb)
    assert emb.shape == (B, EMBED) and emb.dtype == jnp.float32
    ref = _reference_forward(x, params, patch_size=P)
    assert jnp.allclose(emb, ref, atol=5e-2, rtol=5e-2), "mismatch vs f32 reference"

    # Second config exercises multi-step reduction, padded patch rows, and the analytic
    # padded-row correction (N=100 patches, TILE_N forced to 32 -> N_pad=128, 4 tiles).
    x2 = jax.random.normal(jax.random.PRNGKey(1), (1, C, 40, 40), jnp.float32)
    emb2 = jax.block_until_ready(
        inference_encoder_forward(x2, params, patch_size=P, max_tile_n=32))
    ref2 = _reference_forward(x2, params, patch_size=P)
    assert emb2.shape == (1, EMBED)
    assert jnp.allclose(emb2, ref2, atol=5e-2, rtol=5e-2), "mismatch (padded-N config)"

    print("KERNEL_OK")
</pallas_src>

<mosaic_0001>
module attributes {stable_mosaic.version = 11 : i64} {
  func.func @_encoder_kernel(%arg0: i32, %arg1: i32, %arg2: memref<1x16x128xbf16, #tpu.memory_space<vmem>>, %arg3: memref<128x128xbf16, #tpu.memory_space<vmem>>, %arg4: memref<1x128xf32, #tpu.memory_space<vmem>>, %arg5: memref<1x1x128xf32, #tpu.memory_space<vmem>>, %arg6: memref<8x128xf32, #tpu.memory_space<vmem>>) attributes {dimension_semantics = [#tpu.dimension_semantics<parallel>, #tpu.dimension_semantics<arbitrary>], iteration_bounds = array<i64: 2, 1>, scalar_prefetch = 0 : i64, scratch_operands = 1 : i64, tpu.core_type = #tpu.core_type<tc>, window_params = [{transform_indices = @transform_0, window_bounds = array<i64: 1, 16, 128>}, {pipeline_mode = #tpu.pipeline_mode<synchronous>, transform_indices = @transform_1, window_bounds = array<i64: 128, 128>}, {pipeline_mode = #tpu.pipeline_mode<synchronous>, transform_indices = @transform_2, window_bounds = array<i64: 1, 128>}, {transform_indices = @transform_3, window_bounds = array<i64: 1, 1, 128>}]} {
    %c0_i32 = arith.constant 0 : i32
    %0 = arith.cmpi eq, %arg1, %c0_i32 : i32
    %1 = arith.extui %0 : i1 to i32
    %c0_i32_0 = arith.constant 0 : i32
    %2 = arith.cmpi ne, %1, %c0_i32_0 : i32
    scf.if %2 {
      %cst_18 = arith.constant 0.000000e+00 : f32
      %31 = vector.broadcast %cst_18 : f32 to vector<8x128xf32>
      %c0_19 = arith.constant 0 : index
      %c0_20 = arith.constant 0 : index
      %32 = vector.load %arg6[%c0_19, %c0_20] : memref<8x128xf32, #tpu.memory_space<vmem>>, vector<8x128xf32>
      tpu.vector_store %arg6[%c0_19, %c0_20], %31 {strides = array<i32>} : memref<8x128xf32, #tpu.memory_space<vmem>>, vector<8x128xf32>,
    } else {
    }
    %c0 = arith.constant 0 : index
    %c0_1 = arith.constant 0 : index
    %c0_2 = arith.constant 0 : index
    %3 = vector.load %arg2[%c0, %c0_1, %c0_2] : memref<1x16x128xbf16, #tpu.memory_space<vmem>>, vector<1x16x128xbf16>
    %4 = vector.shape_cast %3 : vector<1x16x128xbf16> to vector<16x128xbf16>
    %c0_3 = arith.constant 0 : index
    %c0_4 = arith.constant 0 : index
    %5 = vector.load %arg3[%c0_3, %c0_4] : memref<128x128xbf16, #tpu.memory_space<vmem>>, vector<128x128xbf16>
    %cst = arith.constant dense<0.000000e+00> : vector<16x128xf32>
    %6 = tpu.matmul %4, %5, %cst {dimension_numbers = #tpu.dot_dimension_numbers<[1], [0], [0], [1], [0, 0, 1, 1], [], []>} : vector<16x128xbf16>, vector<128x128xbf16>, vector<16x128xf32> -> vector<16x128xf32>
    %c0_5 = arith.constant 0 : index
    %c0_6 = arith.constant 0 : index
    %7 = vector.load %arg4[%c0_5, %c0_6] : memref<1x128xf32, #tpu.memory_space<vmem>>, vector<1x128xf32>
    %8 = vector.broadcast %7 : vector<1x128xf32> to vector<16x128xf32>
    %9 = arith.addf %6, %8 : vector<16x128xf32>
    %10 = arith.mulf %9, %9 : vector<16x128xf32>
    %11 = arith.mulf %9, %10 : vector<16x128xf32>
    %cst_7 = arith.constant 4.471500e-02 : f32
    %12 = vector.broadcast %cst_7 : f32 to vector<16x128xf32>
    %13 = arith.mulf %12, %11 : vector<16x128xf32>
    %14 = arith.addf %9, %13 : vector<16x128xf32>
    %cst_8 = arith.constant 0.797884583 : f32
    %15 = vector.broadcast %cst_8 : f32 to vector<16x128xf32>
    %16 = arith.mulf %15, %14 : vector<16x128xf32>
    %17 = math.tanh %16 : vector<16x128xf32>
    %cst_9 = arith.constant 1.000000e+00 : f32
    %18 = vector.broadcast %cst_9 : f32 to vector<16x128xf32>
    %19 = arith.addf %18, %17 : vector<16x128xf32>
    %cst_10 = arith.constant 5.000000e-01 : f32
    %20 = vector.broadcast %cst_10 : f32 to vector<16x128xf32>
    %21 = arith.mulf %20, %19 : vector<16x128xf32>
    %22 = arith.mulf %9, %21 : vector<16x128xf32>
    %c0_11 = arith.constant 0 : index
    %c0_12 = arith.constant 0 : index
    %23 = vector.load %arg6[%c0_11, %c0_12] : memref<8x128xf32, #tpu.memory_space<vmem>>, vector<8x128xf32>
    %24 = vector.shape_cast %22 : vector<16x128xf32> to vector<2x8x128xf32>
    %cst_13 = arith.constant dense<0.000000e+00> : vector<8x128xf32>
    %25 = vector.multi_reduction <add>, %24, %cst_13 [0] : vector<2x8x128xf32> to vector<8x128xf32>
    %26 = arith.addf %23, %25 : vector<8x128xf32>
    %c0_14 = arith.constant 0 : index
    %c0_15 = arith.constant 0 : index
    %27 = vector.load %arg6[%c0_14, %c0_15] : memref<8x128xf32, #tpu.memory_space<vmem>>, vector<8x128xf32>
    tpu.vector_store %arg6[%c0_14, %c0_15], %26 {strides = array<i32>} : memref<8x128xf32, #tpu.memory_space<vmem>>, vector<8x128xf32>,
    %c0_i32_16 = arith.constant 0 : i32
    %28 = arith.cmpi eq, %arg1, %c0_i32_16 : i32
    %29 = arith.extui %28 : i1 to i32
    %c0_i32_17 = arith.constant 0 : i32
    %30 = arith.cmpi ne, %29, %c0_i32_17 : i32
    scf.if %30 {
      %c0_18 = arith.constant 0 : index
      %c0_19 = arith.constant 0 : index
      %31 = vector.load %arg6[%c0_18, %c0_19] : memref<8x128xf32, #tpu.memory_space<vmem>>, vector<8x128xf32>
      %cst_20 = arith.constant dense<0.000000e+00> : vector<128xf32>
      %32 = vector.multi_reduction <add>, %31, %cst_20 [0] : vector<8x128xf32> to vector<128xf32>
      %33 = vector.shape_cast %32 : vector<128xf32> to vector<1x128xf32>
      %cst_21 = arith.constant 6.250000e-02 : f32
      %34 = vector.broadcast %cst_21 : f32 to vector<1x128xf32>
      %35 = arith.mulf %33, %34 : vector<1x128xf32>
      %c0_22 = arith.constant 0 : index
      %c0_23 = arith.constant 0 : index
      %c0_24 = arith.constant 0 : index
      %36 = vector.load %arg5[%c0_22, %c0_23, %c0_24] : memref<1x1x128xf32, #tpu.memory_space<vmem>>, vector<1x1x128xf32>
      %37 = vector.shape_cast %36 : vector<1x1x128xf32> to vector<1x128xf32>
      %38 = vector.shape_cast %35 : vector<1x128xf32> to vector<1x1x128xf32>
      tpu.vector_store %arg5[%c0_22, %c0_23, %c0_24], %38 {strides = array<i32>} : memref<1x1x128xf32, #tpu.memory_space<vmem>>, vector<1x1x128xf32>,
    } else {
    }
    return
  }
  func.func @transform_0(%arg0: i32, %arg1: i32) -> (i32, i32, i32) {
    %c0_i32 = arith.constant 0 : i32
    %c0_i32_0 = arith.constant 0 : i32
    return %arg0, %arg1, %c0_i32 : i32, i32, i32
  }
  func.func @transform_1(%arg0: i32, %arg1: i32) -> (i32, i32) {
    %c0_i32 = arith.constant 0 : i32
    %c0_i32_0 = arith.constant 0 : i32
    %c0_i32_1 = arith.constant 0 : i32
    return %c0_i32, %c0_i32_0 : i32, i32
  }
  func.func @transform_2(%arg0: i32, %arg1: i32) -> (i32, i32) {
    %c0_i32 = arith.constant 0 : i32
    %c0_i32_0 = arith.constant 0 : i32
    %c0_i32_1 = arith.constant 0 : i32
    return %c0_i32, %c0_i32_0 : i32, i32
  }
  func.func @transform_3(%arg0: i32, %arg1: i32) -> (i32, i32, i32) {
    %c0_i32 = arith.constant 0 : i32
    %c0_i32_0 = arith.constant 0 : i32
    %c0_i32_1 = arith.constant 0 : i32
    return %arg0, %c0_i32, %c0_i32_0 : i32, i32, i32
  }
}

</mosaic_0001>

<bundles_post_ra>
// kernel: tpu_custom_call.1
= control target key start
LH: loop header
LB: loop body
LE: loop exit
PB: predicated region body
PF: predicated region fallthrough
CT: control target
= control target key end

     0   :  { %8 = vsyncpa [#allocation4], 0  ;;  %s1027_s0 = inlined_call_operand.hbm [shape: bf16[2,16,128], index: 0, kind: input, shape index: {}]   ;;  %s1028_s1 = inlined_call_operand.hbm [shape: bf16[128,128], index: 1, kind: input, shape index: {}]   ;;  %s1029_s2 = inlined_call_operand.vmem [shape: f32[1,128], index: 2, kind: input, shape index: {}]   ;;  %s1030_s3 = inlined_call_operand.hbm [shape: f32[2,1,128], index: 3, kind: output, shape index: {}]  }
   0x1   :  { %10 = vsyncpa [#allocation4 + $0x1], 0 }
   0x2   :  { %11 = vsyncpa [#allocation7], 0 }
   0x3   :  { %12 = vsyncpa [#allocation5], 0 }
   0x4   :  { %14 = vsyncpa [#allocation5 + $0x1], 0  ;;  %s797_s12 = smov 0   ;;  %s799_s13 = smov 0  }
   0x5   :  { %s801_s14 = smov 0   ;;  %s803_s15 = smov 0  }
   0x6   :  { %s805_s16 = smov 0   ;;  %s807_s17 = smov 0  }
   0x7 LB: > { %s480_s18 = sadd.s32 4294967295, %s768_s17   ;;  %s481_s19 = sadd.s32 4294967294, %s768_s17   ;;  %s768_s17 = sphi %s807_s17, %s20_s17   ;;  %s764_s16 = sphi %s805_s16, %s1054_s16   ;;  %s760_s15 = sphi %s803_s15, %s1053_s15   ;;  %s756_s14 = sphi %s801_s14, %s1052_s14   ;;  %s752_s13 = sphi %s799_s13, %s1051_s13   ;;  %s748_s12 = sphi %s797_s12, %s1050_s12  }
   0x8   : > { %p54_p0 = scmp.ne.s32.totalorder %s752_s13, %s748_s12  ;;  %p831_p1 = scmp.eq.s32.totalorder %s480_s18, 0 }
   0x9   : > { %p835_p2 = scmp.eq.s32.totalorder %s480_s18, 1  ;;  %p126_p3 = scmp.eq.s32.totalorder %s481_s19, 1 }
   0xa   : > { %s1035_s20 = scalar_select %p831_p1, 1, 0 }
   0xb   : > { %s1036_s21 = scalar_select %p835_p2, 1, 0 }
   0xc   : > { %p841_p4 = por %p831_p1, %p54_p0  ;;  %p482_p5 = scmp.ge.s32.totalorder %s768_s17, 1 }
   0xd   : > { %p846_p6 = por %p126_p3, %p54_p0  ;;  %p133_p7 = scmp.lt.s32.totalorder %s768_s17, 3 }
   0xe   : > { %s1037_s22 = scalar_select %p841_p4, 1, 0 }
   0xf   : > { %s1038_s23 = scalar_select %p846_p6, 1, 0 }
  0x10   : > { %p851_p8 = pnand %p482_p5, %p133_p7  ;;  %s770_s25 = smov [#allocation6]  }
  0x11   : > { %s145_s26 = sshll.u32 %s770_s25, 4  ;;  %s32_s28 = sadd.s32 1, %s764_s16  ;;  %s146_s26 = int_to_ptr.vmem [resolvable:$true] %s145_s26 }
  0x12   : > { %s1039_s24 = scalar_select %p851_p8, 1, 0 }
  0x13   : > { %p542_p9 = pneg %p851_p8  ;;  %s624_s4 = scalar_lea.hbm %s1028_s1, 1024 }
  0x14   : > { %p625_p12 = scmp.ne.s32.totalorder %s1028_s1, %s624_s4  ;;  %p631_p5 = scmp.lt.u32.totalorder %s624_s4, %s1028_s1 }
  0x15   : > { %p860_p11 = pnand %p542_p9, %p831_p1 }
  0x17   : > { %p626_p13 = pneg %p860_p11 }
  0x19   : > { %p627_p0 = pnand %p626_p13, %p625_p12 }
  0x1b   : > { %p628_p3 = pneg %p627_p0 }
  0x1d   : > { %p633_p7 = pnand %p631_p5, %p628_p3 }
  0x1f   : > { %636 = shalt.err (!%p633_p7)
}
  0x20   : > { %s637_s9 = scalar_lea.vmem %s146_s26, 1024  ;;  %p645_p1 = scmp.lt.s32.totalorder %s146_s26, %s146_s26 }
  0x21   : > { %p638_p9 = scmp.ne.s32.totalorder %s146_s26, %s637_s9  ;;  %p646_p4 = scmp.lt.s32.totalorder %s637_s9, %s637_s9 }
  0x23   : > { %p640_p10 = pnand %p638_p9, %p626_p13  ;;  %p647_p8 = por %p646_p4, %p645_p1 }
  0x25   : > { %p641_p6 = pneg %p640_p10 }
  0x27   : > { %p648_p2 = pnand %p647_p8, %p641_p6 }
  0x29   : > { %651 = shalt.err (!%p648_p2)
}
  0x2a   : > { %s771_s10 = smov 64   ;;  %s772_s11 = smov 4  }
  0x2b   : > { %545 = dma.hbm_to_vmem [thread:$0]  (!%p860_p11), %s1028_s1, 1024, %s146_s26, [#allocation7], %s771_s10, %s771_s10, %s772_s11  }
  0x2c   : > { %p34_p1 = scmp.ge.s32.totalorder %s32_s28, 2  ;;  %s41_s25 = sadd.s32 1, %s756_s14 }
  0x2d   : > { %p48_p2 = scmp.ne.s32.totalorder %s756_s14, %s752_s13  ;;  %p49_p4 = scmp.eq.s32.totalorder %s768_s17, 0 }
  0x2e   : > { %s1056_s28 = smov (%p34_p1, %s32_s28), 0  ;;  %p1042_p8 = scmp.ne.s32.totalorder %s1036_s21, 0 }
  0x2f   : > { %p890_p6 = por %p49_p4, %p48_p2  ;;  %s36_s30 = ssub.s32 %s764_s16, %s1056_s28 }
  0x30   : > { %p896_p10 = por %p1042_p8, %p48_p2  ;;  %p555_p12 = scmp.lt.s32.totalorder %s768_s17, 2 }
  0x31   : > { %p39_p11 = scmp.eq.s32.totalorder %s36_s30, 0  ;;  %s162_s26 = sand.u32 1, %s756_s14  }
  0x32   : > { %s485_s4 = sshll.u32 %s162_s26, 3  ;;  %s504_s6 = sshll.u32 %s764_s16, 7 }
  0x33   : > { %s905_s5 = scalar_select %p39_p11, %s756_s14, %s41_s25  }
  0x34   : > { %s911_s9 = scalar_lea.hbm %s1027_s0, %s504_s6  ;;  %s166_s21 = scalar_lea.vmem [#allocation3], %s485_s4 }
  0x35   : > { %s175_s18 = sshll.u32 %s166_s21, 4  ;;  %p917_p13 = pnand %p555_p12, %p890_p6  ;;  %s913_s18 = int_to_ptr.vmem [resolvable:$true] %s175_s18 }
  0x36   : > { %s921_s25 = scalar_lea.sflag [#allocation4], %s162_s26  ;;  %s652_s30 = scalar_lea.hbm %s911_s9, 128 }
  0x37   : > { %p653_p0 = scmp.ne.s32.totalorder %s911_s9, %s652_s30  ;;  %p654_p3 = pneg %p917_p13 }
  0x38   : > { %s657_s29 = scalar_lea.hbm %s1027_s0, 256  ;;  %p658_p9 = scmp.lt.u32.totalorder %s911_s9, %s1027_s0 }
  0x39   : > { %p655_p5 = pnand %p654_p3, %p653_p0  ;;  %p659_p1 = scmp.lt.u32.totalorder %s657_s29, %s652_s30 }
  0x3a   : > { %p661_p4 = scmp.lt.u32.totalorder %s652_s30, %s911_s9 }
  0x3b   : > { %p656_p7 = pneg %p655_p5  ;;  %p660_p2 = por %p659_p1, %p658_p9 }
  0x3d   : > { %p662_p6 = por %p661_p4, %p660_p2 }
  0x3f   : > { %p663_p8 = pnand %p662_p6, %p656_p7 }
  0x41   : > { %666 = shalt.err (!%p663_p8)
}
  0x42   : > { %s667_s26 = scalar_lea.vmem %s913_s18, 128  ;;  %s773_s21 = smov [#allocation3]  }
  0x43   : > { %p668_p12 = scmp.ne.s32.totalorder %s913_s18, %s667_s26  ;;  %s672_s4 = sshll.u32 %s773_s21, 4  ;;  %s673_s4 = int_to_ptr.vmem [resolvable:$false] %s672_s4 }
  0x44   : > { %s674_s6 = scalar_lea.vmem %s673_s4, 256  ;;  %p675_p5 = scmp.lt.s32.totalorder %s913_s18, %s673_s4 }
  0x45   : > { %p670_p11 = pnand %p668_p12, %p654_p3  ;;  %p676_p9 = scmp.lt.s32.totalorder %s674_s6, %s667_s26 }
  0x47   : > { %p671_p0 = pneg %p670_p11  ;;  %p677_p1 = por %p676_p9, %p675_p5 }
  0x49   : > { %p678_p2 = pnand %p677_p1, %p671_p0 }
  0x4b   : > { %681 = shalt.err (!%p678_p2)
}
  0x4c   : > { %549 = dma.hbm_to_vmem [thread:$0]  (!%p917_p13), %s911_s9, 128, %s913_s18, %s921_s25, %s771_s10, %s771_s10, %s772_s11  }
  0x4d   : > { %p1045_p3 = scmp.ne.s32.totalorder %s1039_s24, 0 }
  0x4e   : > { %s955_s30 = sand.u32 (!%p1045_p3), 1, %s752_s13   ;;  %p1046_p7 = scmp.ne.s32.totalorder (!%p1045_p3), %s1037_s22, 0 }
  0x4f   : > { %187 = sbr.rel (%p1045_p3) target bundleno = 396 (0x18c), region = 32  ;;  %s489_s29 = sshll.u32 (!%p1045_p3), %s955_s30, 3 }
  0x50   : > { %s190_s7 = scalar_lea.sflag (!%p1045_p3), [#allocation4], %s955_s30  ;;  %s959_s8 = scalar_lea.vmem (!%p1045_p3), [#allocation3], %s489_s29 }
  0x56   : > { %735 = dma.done.wait (%p1046_p7), %s190_s7, 128  }
  0x57   : > { %737 = vsyncadd (%p1046_p7), %s190_s7, 4294967168  ;;  %p1047_p13 = scmp.ne.s32.totalorder %s1035_s20, 0 }
  0x59   : > { %739 = dma.done.wait (%p1047_p13), [#allocation7], 1024  }
  0x5a   : > { %741 = vsyncadd (%p1047_p13), [#allocation7], 4294966272  ;;  %v774_v0 = vmov 0.0   ;;  %vm775_vm0 = vmmov 0   ;;  %v611_v1 = vld [vmem:[#allocation6] sm:$0xff]   ;;  %v612_v2 = vld [vmem:[#allocation6 + $0x8] sm:$0xff]  }
  0x5b   : > { %514 = vmatprep.subr.bf16.mxu0 %v774_v0  ;;  %530 = vmatprep.mubr.msk.bf16.mxu0 %vm775_vm0, %v774_v0  ;;  %v613_v3 = vld [vmem:[#allocation6 + $0x10] sm:$0xff]   ;;  %v614_v4 = vld [vmem:[#allocation6 + $0x18] sm:$0xff]   ;;  %v615_v5 = vld [vmem:[#allocation6 + $0x20] sm:$0xff]   ;;  %s501_s24 = sshll.u32 %s760_s15, 4  ;;  %s218_s10 = scalar_lea.vmem [#allocation8], %s955_s30 }
  0x5c   : > { %515 = vmatpush3.bf16.msra.mxu0 %v611_v1  ;;  %v616_v6 = vld [vmem:[#allocation6 + $0x28] sm:$0xff]   ;;  %v617_v7 = vld [vmem:[#allocation6 + $0x30] sm:$0xff]   ;;  %v618_v8 = vld [vmem:[#allocation6 + $0x38] sm:$0xff]   ;;  %s393_s11 = sshll.u32 %s218_s10, 4  ;;  %s978_s19 = scalar_lea.hbm %s1030_s3, %s501_s24  ;;  %s980_s11 = int_to_ptr.vmem [resolvable:$true] %s393_s11 }
  0x5d   : > { %516 = vmatprep.subr.bf16.mxu0 %v774_v0  ;;  %v619_v9 = vld [vmem:[%s959_s8] sm:$0xff]   ;;  %s381_s25 = scalar_lea.sflag [#allocation5], %s955_s30  ;;  %s682_s26 = scalar_lea.vmem %s980_s11, 16 }
  0x5e   : > { %v491_v10 = vld [vmem:[%s1029_s2] ss:$0 sm:$0xff]  ;;  %p683_p4 = scmp.ne.s32.totalorder %s980_s11, %s682_s26  ;;  %s776_s15 = smov [#allocation8]  }
  0x5f   : > { %s686_s21 = sshll.u32 %s776_s15, 4  ;;  %s687_s21 = int_to_ptr.vmem [resolvable:$false] %s686_s21 }
  0x60   : > { %517 = vmatpush3.bf16.msra.mxu0 %v612_v2  ;;  %p684_p6 = pnand %p683_p4, %p896_p10  ;;  %s688_s4 = scalar_lea.vmem %s687_s21, 32 }
  0x61   : > { %518 = vmatprep.subr.bf16.mxu0 %v774_v0  ;;  %p689_p12 = scmp.lt.s32.totalorder %s980_s11, %s687_s21  ;;  %p690_p11 = scmp.lt.s32.totalorder %s688_s4, %s682_s26 }
  0x62   : > { %p685_p8 = pneg %p684_p6 }
  0x63   : > { %p691_p0 = por %p690_p11, %p689_p12 }
  0x64   : > { %519 = vmatpush3.bf16.msra.mxu0 %v613_v3 }
  0x65   : > { %520 = vmatprep.subr.bf16.mxu0 %v774_v0  ;;  %p692_p5 = pnand %p691_p0, %p685_p8 }
  0x68   : > { %521 = vmatpush3.bf16.msra.mxu0 %v614_v4 }
  0x69   : > { %522 = vmatprep.subr.bf16.mxu0 %v774_v0 }
  0x6c   : > { %523 = vmatpush3.bf16.msra.mxu0 %v615_v5 }
  0x6d   : > { %524 = vmatprep.subr.bf16.mxu0 %v774_v0 }
  0x70   : > { %525 = vmatpush3.bf16.msra.mxu0 %v616_v6 }
  0x71   : > { %526 = vmatprep.subr.bf16.mxu0 %v774_v0 }
  0x74   : > { %527 = vmatpush3.bf16.msra.mxu0 %v617_v7 }
  0x75   : > { %528 = vmatprep.subr.bf16.mxu0 %v774_v0 }
  0x78   : > { %529 = vmatpush3.bf16.msra.mxu0 %v618_v8 }
  0x7b   : > { %531 = vmatmul.mubr.bf16.vlgmr.msra.gmra.mrb[0].mxu0 %v619_v9 }
 0x14e   : > { %v339_v11 = vpop.f32.mrb[0].mxu0 }
 0x14f   : > { %v340_v12 = vadd.f32 %v491_v10, %v339_v11  ;;  %v532_v13 = vpop.f32.mrb[1].mxu0 }
 0x150   : > { %v342_v14 = vpop.f32.mrb[2].mxu0 }
 0x151   : > { %v346_v15 = vmul.f32 %v340_v12, %v340_v12  ;;  %v343_v16 = vadd.f32 %v491_v10, %v342_v14  ;;  %v533_v17 = vpop.f32.mrb[3].mxu0 }
 0x153   : > { %v348_v18 = vmul.f32 %v346_v15, %v340_v12  ;;  %v347_v19 = vmul.f32 %v343_v16, %v343_v16 }
 0x155   : > { %v350_v20 = vmul.f32 0.044715, %v348_v18  ;;  %v349_v21 = vmul.f32 %v347_v19, %v343_v16 }
 0x157   : > { %v352_v22 = vadd.f32 %v350_v20, %v340_v12  ;;  %v351_v23 = vmul.f32 0.044715, %v349_v21 }
 0x159   : > { %v354_v24 = vmul.f32 0.7978846, %v352_v22  ;;  %v353_v25 = vadd.f32 %v351_v23, %v343_v16 }
 0x15b   : > { %620 = vtanh.f32 %v354_v24  ;;  %v355_v26 = vmul.f32 0.7978846, %v353_v25 }
 0x15d   : > { %622 = vtanh.f32 %v355_v26 }
 0x165   : > { %v621_v27 = vpop.eup %620 }
 0x166   : > { %v358_v28 = vadd.f32 1.0, %v621_v27 }
 0x167   : > { %v623_v29 = vpop.eup %622 }
 0x168   : > { %v360_v30 = vmul.f32 0.5, %v358_v28  ;;  %v359_v31 = vadd.f32 1.0, %v623_v29 }
 0x16a   : > { %v361_v32 = vmul.f32 0.5, %v359_v31  ;;  %v362_v33 = vmul.f32 %v360_v30, %v340_v12 }
 0x16c   : > { %v363_v34 = vmul.f32 %v361_v32, %v343_v16 }
 0x16e   : > { %v365_v35 = vadd.f32 %v363_v34, %v362_v33 }
 0x170   : > { %v372_v36 = vrot.slane %v365_v35, 4 }
 0x172   : > { %v373_v37 = vadd.f32 %v372_v36, %v365_v35 }
 0x174   : > { %v374_v38 = vrot.slane %v373_v37, 2 }
 0x176   : > { %v375_v39 = vadd.f32 %v374_v38, %v373_v37 }
 0x178   : > { %v376_v40 = vrot.slane %v375_v39, 1 }
 0x17a   : > { %v377_v41 = vadd.f32 %v376_v40, %v375_v39 }
 0x17c   : > { %v378_v42 = vmul.f32 0.0625, %v377_v41 }
 0x17e   : > { %379 = vst [vmem:[%s218_s10] sm:$0x1] %v378_v42 }
 0x17f   : > { %695 = shalt.err (!%p692_p5)
}
 0x180   : > { %s696_s6 = scalar_lea.hbm %s978_s19, 16  ;;  %s700_s7 = scalar_lea.hbm %s1030_s3, 32 }
 0x181   : > { %p697_p9 = scmp.ne.s32.totalorder %s978_s19, %s696_s6  ;;  %p701_p3 = scmp.lt.u32.totalorder %s978_s19, %s1030_s3 }
 0x182   : > { %p702_p7 = scmp.lt.u32.totalorder %s700_s7, %s696_s6  ;;  %p704_p4 = scmp.lt.u32.totalorder %s696_s6, %s978_s19 }
 0x183   : > { %p698_p1 = pnand %p697_p9, %p896_p10 }
 0x184   : > { %p703_p13 = por %p702_p7, %p701_p3 }
 0x185   : > { %p699_p2 = pneg %p698_p1 }
 0x186   : > { %p705_p6 = por %p704_p4, %p703_p13 }
 0x188   : > { %p706_p8 = pnand %p705_p6, %p699_p2 }
 0x18a   : > { %709 = shalt.err (!%p706_p8)
}
 0x18b   : > { %540 = dma.vmem_to_hbm [thread:$0]  (%p896_p10), %s980_s11, 16, %s978_s19, %s381_s25  }
 0x18c PF: > { %s405_s22 = sand.u32 1, %s748_s12   ;;  %p1048_p12 = scmp.ne.s32.totalorder %s1038_s23, 0 }
 0x18d   : > { %p1049_p11 = scmp.ge.s32.totalorder %s768_s17, 2  ;;  %s406_s24 = scalar_lea.sflag [#allocation5], %s405_s22 }
 0x18f   : > { %p551_p0 = pnand %p1049_p11, %p1048_p12 }
 0x191   : > { %743 = dma.done.wait (!%p551_p0), %s406_s24, 16  }
 0x192   : > { %745 = vsyncadd (!%p551_p0), %s406_s24, 4294967280  ;;  %s20_s17 = sadd.s32 1, %s768_s17   ;;  %s1050_s12 = smov %s752_s13 }
 0x193   : > { %p17_p5 = scmp.ge.s32.totalorder %s20_s17, 4   ;;  %s1051_s13 = smov %s756_s14 }
 0x194   : > { %s1052_s14 = smov %s905_s5  ;;  %s1053_s15 = smov %s764_s16 }
 0x195   : > { %s1054_s16 = smov %s1056_s28  ;;  %19 = sbr.rel (!%p17_p5) target bundleno = 7 (0x7), region = 89 }
 0x19c   :  { %410 = vsyncpa [#allocation4], 1 }
 0x19d   :  { %412 = vsyncpa [#allocation4 + $0x1], 1 }
 0x19e   :  { %413 = vsyncpa [#allocation7], 1 }
 0x19f   :  { %414 = vsyncpa [#allocation5], 1 }
 0x1a0   :  { %416 = vsyncpa [#allocation5 + $0x1], 1 }

</bundles_post_ra>
